<compile_context>
chip_gen: v5e
topology: v5e:2x2
jax: 0.10.0
libtpu: 0.0.40
codegen_flags: <defaults>
</compile_context>

<pallas_src>
import math

import jax
import jax.numpy as jnp
from jax.experimental import pallas as pl
from jax.experimental.pallas import tpu as pltpu


def _identity_copy_kernel(x_ref, o_ref):
    # view_as_real(view_as_complex(x)) == x on the real (..., 2) layout;
    # the kernel just streams the current tile through VMEM.
    o_ref[...] = x_ref[...]


_TARGET_TILE_BYTES = 2 * 1024 * 1024  # per buffer; x2 (in/out) x2 (dbl-buf) <= 8 MiB VMEM


def _pick_2d_layout(shape):
    """Pick a lane-dense (rows, cols) flattening; reshape is metadata-only."""
    n = math.prod(shape)
    for cols in (4096, 2048, 1024, 512, 256, 128):
        if n % cols == 0:
            return n // cols, cols
    # Ragged fallback: keep the trailing (pair, 2) axes contiguous in lanes.
    cols = (shape[-2] if len(shape) >= 2 else 1) * shape[-1]
    return n // cols, cols


def complex_conversion(x: jax.Array) -> jax.Array:
    """Pallas equivalent of torch.view_as_real(torch.view_as_complex(x))."""
    if x.ndim < 1 or x.shape[-1] != 2:
        raise ValueError("last dimension must be 2 (real, imag pairs)")
    if x.dtype not in (jnp.float32, jnp.bfloat16, jnp.float16):
        raise ValueError("expected a TPU-supported floating dtype")

    orig_shape = x.shape
    rows, cols = _pick_2d_layout(orig_shape)
    x2d = x.reshape(rows, cols)

    itemsize = jnp.dtype(x.dtype).itemsize
    sublane = 8 * (4 // itemsize)  # 8 rows for f32, 16 for bf16/f16 packing
    row_bytes = max(cols * itemsize, 1)
    tile_r = max(sublane, (_TARGET_TILE_BYTES // row_bytes) // sublane * sublane)
    tile_r = min(tile_r, rows)  # full extent (always legal) for small inputs
    grid_r = pl.cdiv(rows, tile_r)

    out2d = pl.pallas_call(
        _identity_copy_kernel,
        out_shape=jax.ShapeDtypeStruct((rows, cols), x.dtype),
        grid_spec=pltpu.PrefetchScalarGridSpec(
            num_scalar_prefetch=0,
            grid=(grid_r,),
            in_specs=[pl.BlockSpec((tile_r, cols), lambda i: (i, 0))],
            out_specs=pl.BlockSpec((tile_r, cols), lambda i: (i, 0)),
        ),
        # Output aliases input buffer: zero-copy when the caller donates x.
        input_output_aliases={0: 0},
        compiler_params=pltpu.CompilerParams(
            dimension_semantics=("parallel",),
        ),
    )(x2d)

    return out2d.reshape(orig_shape)


if __name__ == "__main__":
    key = jax.random.PRNGKey(0)
    # batch=2, channels=4, seq=16, (real, imag) pairs -- valid view_as_complex input.
    x = jax.random.normal(key, (2, 4, 16, 2), dtype=jnp.float32)
    out = jax.block_until_ready(complex_conversion(x))
    assert out.shape == x.shape, (out.shape, x.shape)
    assert out.dtype == x.dtype
    assert bool(jnp.array_equal(out, x)), "round-trip must be an exact identity"

    # 1-D input (a single complex number) -- exercises the ndim==1 path.
    x1d = jax.random.normal(jax.random.PRNGKey(1), (2,), dtype=jnp.float32)
    out1d = jax.block_until_ready(complex_conversion(x1d))
    assert bool(jnp.array_equal(out1d, x1d))

    # Ragged shape (no 128-multiple factorization) + bf16 -- fallback layout.
    xr = jax.random.normal(jax.random.PRNGKey(2), (3, 5, 2), dtype=jnp.bfloat16)
    outr = jax.block_until_ready(complex_conversion(xr))
    assert bool(jnp.array_equal(outr, xr))

    print("KERNEL_OK")
</pallas_src>

<mosaic_0001>
module attributes {stable_mosaic.version = 11 : i64} {
  func.func @_identity_copy_kernel(%arg0: i32, %arg1: memref<1x256xf32, #tpu.memory_space<vmem>>, %arg2: memref<1x256xf32, #tpu.memory_space<vmem>>) attributes {dimension_semantics = [#tpu.dimension_semantics<parallel>], iteration_bounds = array<i64: 1>, scalar_prefetch = 0 : i64, scratch_operands = 0 : i64, tpu.core_type = #tpu.core_type<tc>, window_params = [{transform_indices = @transform_0, window_bounds = array<i64: 1, 256>}, {transform_indices = @transform_1, window_bounds = array<i64: 1, 256>}]} {
    %c0 = arith.constant 0 : index
    %c0_0 = arith.constant 0 : index
    %0 = vector.load %arg1[%c0, %c0_0] : memref<1x256xf32, #tpu.memory_space<vmem>>, vector<1x256xf32>
    %c0_1 = arith.constant 0 : index
    %c0_2 = arith.constant 0 : index
    %1 = vector.load %arg2[%c0_1, %c0_2] : memref<1x256xf32, #tpu.memory_space<vmem>>, vector<1x256xf32>
    tpu.vector_store %arg2[%c0_1, %c0_2], %0 {strides = array<i32>} : memref<1x256xf32, #tpu.memory_space<vmem>>, vector<1x256xf32>,
    return
  }
  func.func @transform_0(%arg0: i32) -> (i32, i32) {
    %c0_i32 = arith.constant 0 : i32
    %c0_i32_0 = arith.constant 0 : i32
    return %arg0, %c0_i32 : i32, i32
  }
  func.func @transform_1(%arg0: i32) -> (i32, i32) {
    %c0_i32 = arith.constant 0 : i32
    %c0_i32_0 = arith.constant 0 : i32
    return %arg0, %c0_i32 : i32, i32
  }
}

</mosaic_0001>

<bundles_post_ra>
// kernel: tpu_custom_call.1
= control target key start
LH: loop header
LB: loop body
LE: loop exit
PB: predicated region body
PF: predicated region fallthrough
CT: control target
= control target key end

     0   :  { %6 = vsyncpa [#allocation3], 0  ;;  %s118_s0 = inlined_call_operand.hbm [shape: f32[1,256], index: 0, kind: input, shape index: {}, may-alias: {0,1}]   ;;  %s119_s1 = inlined_call_operand.hbm [shape: f32[1,256], index: 1, kind: output, shape index: {}, may-alias: {0,1}]  }
   0x1   :  { %7 = vsyncpa [#allocation4], 0  ;;  %s13_s8 = sshll.u32 %s118_s0, 4  ;;  %s100_s9 = smov [#allocation2]   ;;  %s14_s8 = int_to_ptr.hbm [resolvable:$true] %s13_s8 }
   0x2   :  { %s15_s10 = sshll.u32 %s100_s9, 4  ;;  %s16_s10 = int_to_ptr.vmem [resolvable:$true] %s15_s10 }
   0x3   :  { %18 = dma.hbm_to_vmem [thread:$0]  %s14_s8, 32, %s16_s10, [#allocation3]  }
   0x4   :  { %96 = dma.done.wait [#allocation3], 32  }
   0x5   :  { %97 = vsyncadd [#allocation3], 4294967264  ;;  %v24_v0 = vlaneseq  ;;  %s101_s11 = smov [#allocation5]   ;;  %s36_s15 = sshll.u32 %s119_s1, 4  ;;  %v23_v1 = vld [vmem:[#allocation2] sm:$0x3]  ;;  %s37_s15 = int_to_ptr.hbm [resolvable:$true] %s36_s15 }
   0x6   :  { %s34_s12 = sshll.u32 %s101_s11, 4  ;;  %s35_s12 = int_to_ptr.vmem [resolvable:$true] %s34_s12 }
   0x7   :  { %vm26_vm0 = vcmp.lt.s32.totalorder %v24_v0, 256 }
   0x8   :  { %28 = vst.msk [vmem:[#allocation5] sm:$0x3] %vm26_vm0, %v23_v1 }
   0x9   :  { %39 = dma.vmem_to_hbm [thread:$0]  %s35_s12, 32, %s37_s15, [#allocation4]  }
   0xa   :  { %98 = dma.done.wait [#allocation4], 32  }
   0xb   :  { %99 = vsyncadd [#allocation4], 4294967264 }
   0xc   :  { %44 = vsyncpa [#allocation3], 1 }
   0xd   :  { %45 = vsyncpa [#allocation4], 1 }

</bundles_post_ra>
